<compile_context>
chip_gen: v7x
topology: tpu7x:2x2x1
jax: 0.10.0
libtpu: 0.0.40
codegen_flags: <defaults>
</compile_context>

<pallas_src>
import jax
import jax.numpy as jnp
from jax.experimental import pallas as pl
from jax.experimental.pallas import tpu as pltpu


_VMEM_LIMIT_BYTES = 48 * 1024 * 1024     # <= v7x 64 MiB/TC; fine on v5e/v6e


def _round_up(n, m):
    return ((n + m - 1) // m) * m


# --------------------------- Pallas kernels ---------------------------------

def _matmul_bias_relu_kernel(p_ref, w_ref, b_ref, o_ref):
    """Fused conv-as-matmul tile: relu(patches @ W + b).

    p_ref : VMEM (tm, 9*Cin)  bf16 im2col patch tile.
    w_ref : VMEM (9*Cin, Cout) bf16 reshaped conv weights.
    b_ref : VMEM (1, Cout)     f32 bias.
    o_ref : VMEM (tm, Cout)    bf16 output tile (true Cout, no 128 pad).
    """
    acc = jnp.dot(p_ref[...], w_ref[...], preferred_element_type=jnp.float32)
    o_ref[...] = jnp.maximum(acc + b_ref[...], 0.0).astype(o_ref.dtype)


def _backproject_kernel(kinv_ref, o_ref):
    """rays[b, :, i, j] = K^{-1}[b] @ (j, i, 1), VPU only, single grid step.

    kinv_ref : SMEM (B, 9) f32  row-major 3x3 inverse intrinsics per batch.
    o_ref    : VMEM (B, 3, h, w) f32.
    """
    Bn, _, h, w = o_ref.shape
    i_grid = jax.lax.broadcasted_iota(jnp.int32, (h, w), 0).astype(jnp.float32)
    j_grid = jax.lax.broadcasted_iota(jnp.int32, (h, w), 1).astype(jnp.float32)
    ones = jnp.ones((h, w), jnp.float32)
    for bb in range(Bn):                       # small static batch loop
        a00 = kinv_ref[bb, 0]; a01 = kinv_ref[bb, 1]; a02 = kinv_ref[bb, 2]
        a10 = kinv_ref[bb, 3]; a11 = kinv_ref[bb, 4]; a12 = kinv_ref[bb, 5]
        a20 = kinv_ref[bb, 6]; a21 = kinv_ref[bb, 7]; a22 = kinv_ref[bb, 8]
        o_ref[bb, 0, :, :] = a00 * j_grid + a01 * i_grid + a02 * ones
        o_ref[bb, 1, :, :] = a10 * j_grid + a11 * i_grid + a12 * ones
        o_ref[bb, 2, :, :] = a20 * j_grid + a21 * i_grid + a22 * ones


# --------------------------- kernel wrappers ---------------------------------

def conv3x3_relu_pallas(x_nhwc, w, b, stride, *, tile_m=1024,
                        out_dtype=jnp.bfloat16):
    """Conv2d(kernel=3, padding=1, stride) + bias + ReLU.

    x_nhwc: [B, H, W, Cin]   w: [3, 3, Cin, Cout]   b: [Cout]
    Returns [B, Ho, Wo, Cout] in `out_dtype`.
    # TODO(synk): createCNNs' exact conv hyper-params (padding/BN) are unknown;
    # assuming padding=1, bias, ReLU, no BatchNorm.
    """
    B, H, W, Cin = x_nhwc.shape
    Cout = w.shape[-1]
    s = int(stride)
    Ho = (H + 2 - 3) // s + 1
    Wo = (W + 2 - 3) // s + 1
    K = 9 * Cin

    # bf16 first, then a single spatial pad (one XLA pass over activations).
    xp = jnp.pad(x_nhwc.astype(jnp.bfloat16), ((0, 0), (1, 1), (1, 1), (0, 0)))
    # 9 shifted/strided tap views concatenated along channel -> lane-dense
    # patch matrix (B*Ho*Wo, 9*Cin); conv stride folded into the slicing.
    taps = [xp[:, di:di + (Ho - 1) * s + 1:s, dj:dj + (Wo - 1) * s + 1:s, :]
            for di in range(3) for dj in range(3)]
    patches = jnp.concatenate(taps, axis=-1).reshape(B * Ho * Wo, K)

    M = B * Ho * Wo
    tm = min(tile_m, _round_up(M, 8))
    M_pad = _round_up(M, tm)
    if M_pad != M:
        patches = jnp.pad(patches, ((0, M_pad - M), (0, 0)))

    # Weight layout matches the tap-major patch channel order:
    # feature index = (di*3 + dj)*Cin + c.
    w2 = w.astype(jnp.float32).reshape(K, Cout).astype(jnp.bfloat16)
    b2 = b.astype(jnp.float32).reshape(1, Cout)

    out = pl.pallas_call(
        _matmul_bias_relu_kernel,
        out_shape=jax.ShapeDtypeStruct((M_pad, Cout), out_dtype),
        grid=(M_pad // tm,),
        in_specs=[
            pl.BlockSpec((tm, K), lambda i: (i, 0)),
            pl.BlockSpec((K, Cout), lambda i: (0, 0)),
            pl.BlockSpec((1, Cout), lambda i: (0, 0)),
        ],
        out_specs=pl.BlockSpec((tm, Cout), lambda i: (i, 0)),
        compiler_params=pltpu.CompilerParams(
            dimension_semantics=("parallel",),
            vmem_limit_bytes=_VMEM_LIMIT_BYTES),
    )(patches, w2, b2)

    return out[:M].reshape(B, Ho, Wo, Cout)


def _inv3x3(K):
    """Closed-form 3x3 inverse (adjugate / det), batched. Returns (B, 9)."""
    a, b_, c = K[:, 0, 0], K[:, 0, 1], K[:, 0, 2]
    d, e, f = K[:, 1, 0], K[:, 1, 1], K[:, 1, 2]
    g, h, i = K[:, 2, 0], K[:, 2, 1], K[:, 2, 2]
    A = e * i - f * h
    Bc = -(d * i - f * g)
    Cc = d * h - e * g
    D = -(b_ * i - c * h)
    E = a * i - c * g
    F = -(a * h - b_ * g)
    G = b_ * f - c * e
    Hc = -(a * f - c * d)
    I = a * e - b_ * d
    det = a * A + b_ * Bc + c * Cc
    inv = jnp.stack([A, D, G, Bc, E, Hc, Cc, F, I], axis=-1) / det[:, None]
    return inv.astype(jnp.float32)


def backproject_pallas(intrinsic3, h, w):
    """RF3_index = (K3^{-1} @ set_id_grid(...)^T)^T, fused into one VPU kernel.

    Returns (B, h*w, 3) with the PyTorch reference layout
    (row = i*w + j, columns = K^{-1} @ (j, i, 1)).
    """
    B = intrinsic3.shape[0]
    kinv = _inv3x3(intrinsic3.astype(jnp.float32))          # (B, 9)
    rays = pl.pallas_call(
        _backproject_kernel,
        out_shape=jax.ShapeDtypeStruct((B, 3, h, w), jnp.float32),
        in_specs=[pl.BlockSpec(memory_space=pltpu.MemorySpace.SMEM)],
        out_specs=pl.BlockSpec(memory_space=pltpu.MemorySpace.VMEM),
    )(kinv)
    return rays.reshape(B, 3, h * w).transpose(0, 2, 1)     # (B, h*w, 3)


# --------------------------- plain-JAX glue ----------------------------------

def change_intrinsic_jax(intrinsic, rf_hw, img_hw):
    """Mirror of torch change_intrinsic (scale fx/cx by W ratio, fy/cy by H)."""
    Hf, Wf = rf_hw
    Hi, Wi = img_hw
    sx = Wf / Wi
    sy = Hf / Hi
    K = intrinsic
    K = K.at[:, 0, 0].multiply(sx)
    K = K.at[:, 0, 2].multiply(sx)
    K = K.at[:, 1, 1].multiply(sy)
    K = K.at[:, 1, 2].multiply(sy)
    return K


# --------------------------- model ------------------------------------------

class RegNetV2Pallas:
    """Partial RegNet_v2 forward: RGB feature pyramid + RF3 ray back-projection."""

    def __init__(self, key, rgb_channels=(3, 8, 16, 32), strides=(2, 2, 1)):
        keys = jax.random.split(key, len(strides))
        self.params = []
        for i, s in enumerate(strides):
            cin, cout = rgb_channels[i], rgb_channels[i + 1]
            fan_in = 9 * cin
            w = (jax.random.normal(keys[i], (3, 3, cin, cout), jnp.float32)
                 / jnp.sqrt(float(fan_in)))
            b = jnp.zeros((cout,), jnp.float32)
            self.params.append((w, b, s))
        # TODO(synk): cfg.sq_init / cfg.sx_init not given; deterministic defaults.
        self.sq = jnp.array([-2.5], jnp.float32)
        self.sx = jnp.array([0.0], jnp.float32)

    def __call__(self, rgb_img, lidar_img, intrinsic):
        B, _, H, W = rgb_img.shape
        intrinsic = intrinsic.astype(jnp.float32)

        # RGB encoder: RF1 = RGB_net1(rgb); RF2 = RGB_net2(RF1); RF3 = RGB_net3(RF2)
        x = jnp.transpose(rgb_img, (0, 2, 3, 1))               # NCHW -> NHWC
        for w, b, s in self.params:
            x = conv3x3_relu_pallas(x, w, b, s)                 # bf16 activations
        RF3 = x                                                 # [B, H3, W3, C3]
        _, H3, W3, C3 = RF3.shape

        # intrinsic_3 = change_intrinsic(intrinsic, RF3, rgb_img)
        intrinsic_3 = change_intrinsic_jax(intrinsic, (H3, W3), (H, W))

        # RF3_index = bmm(inverse(intrinsic_3), set_id_grid(...)^T)^T as one
        # Pallas VPU kernel (pixel grid via in-kernel iota, general 3x3 K^-1).
        RF3_index = backproject_pallas(intrinsic_3, H3, W3)

        # RF3 reshaped to (B, H3*W3, C3) == RF3_cv1 in the reference forward.
        RF3_cv1 = RF3.reshape(B, H3 * W3, C3).astype(jnp.float32)

        # TODO(synk): ProjectPointNet (LiDAR pyramid), CostVolume1/2, FlowPredictor,
        # ProjSetUpconvModule, PoseHead, warp_utils (dual-quaternion iteration),
        # project_seq, get_idx_cuda, check_valid were not provided in the source,
        # so out_3 / result_4 of the original forward cannot be reproduced.
        return RF3_cv1, RF3_index, intrinsic_3, self.sx, self.sq


# --------------------------- main --------------------------------------------

if __name__ == "__main__":
    key = jax.random.PRNGKey(0)
    k_rgb, k_lidar, k_params = jax.random.split(key, 3)

    B, H, W = 2, 16, 16
    rgb_img = jax.random.normal(k_rgb, (B, 3, H, W), jnp.float32)      # NCHW
    lidar_img = jax.random.normal(k_lidar, (B, 64, 3), jnp.float32)    # unused (TODO)
    K_one = jnp.array([[120.0, 0.0, W / 2.0],
                       [0.0, 120.0, H / 2.0],
                       [0.0, 0.0, 1.0]], jnp.float32)
    intrinsic = jnp.tile(K_one[None], (B, 1, 1))                        # (B, 3, 3)

    model = RegNetV2Pallas(k_params)
    outputs = model(rgb_img, lidar_img, intrinsic)
    jax.block_until_ready(outputs)
    print("KERNEL_OK")
</pallas_src>

<mosaic_0001>
module attributes {stable_mosaic.version = 11 : i64} {
  func.func @_matmul_bias_relu_kernel(%arg0: i32, %arg1: memref<128x27xbf16, #tpu.memory_space<vmem>>, %arg2: memref<27x8xbf16, #tpu.memory_space<vmem>>, %arg3: memref<1x8xf32, #tpu.memory_space<vmem>>, %arg4: memref<128x8xbf16, #tpu.memory_space<vmem>>) attributes {dimension_semantics = [#tpu.dimension_semantics<parallel>], iteration_bounds = array<i64: 1>, scalar_prefetch = 0 : i64, scratch_operands = 0 : i64, tpu.core_type = #tpu.core_type<tc>, window_params = [{transform_indices = @transform_0, window_bounds = array<i64: 128, 27>}, {pipeline_mode = #tpu.pipeline_mode<synchronous>, transform_indices = @transform_1, window_bounds = array<i64: 27, 8>}, {pipeline_mode = #tpu.pipeline_mode<synchronous>, transform_indices = @transform_2, window_bounds = array<i64: 1, 8>}, {transform_indices = @transform_3, window_bounds = array<i64: 128, 8>}]} {
    %c0 = arith.constant 0 : index
    %c0_0 = arith.constant 0 : index
    %0 = vector.load %arg1[%c0, %c0_0] : memref<128x27xbf16, #tpu.memory_space<vmem>>, vector<128x27xbf16>
    %c0_1 = arith.constant 0 : index
    %c0_2 = arith.constant 0 : index
    %1 = vector.load %arg2[%c0_1, %c0_2] : memref<27x8xbf16, #tpu.memory_space<vmem>>, vector<27x8xbf16>
    %cst = arith.constant dense<0.000000e+00> : vector<128x8xf32>
    %2 = tpu.matmul %0, %1, %cst {dimension_numbers = #tpu.dot_dimension_numbers<[1], [0], [0], [1], [0, 0, 1, 1], [], []>} : vector<128x27xbf16>, vector<27x8xbf16>, vector<128x8xf32> -> vector<128x8xf32>
    %c0_3 = arith.constant 0 : index
    %c0_4 = arith.constant 0 : index
    %3 = vector.load %arg3[%c0_3, %c0_4] : memref<1x8xf32, #tpu.memory_space<vmem>>, vector<1x8xf32>
    %4 = vector.broadcast %3 : vector<1x8xf32> to vector<128x8xf32>
    %5 = arith.addf %2, %4 : vector<128x8xf32>
    %cst_5 = arith.constant 0.000000e+00 : f32
    %6 = vector.broadcast %cst_5 : f32 to vector<128x8xf32>
    %7 = arith.maximumf %5, %6 : vector<128x8xf32>
    %8 = arith.truncf %7 : vector<128x8xf32> to vector<128x8xbf16>
    %c0_6 = arith.constant 0 : index
    %c0_7 = arith.constant 0 : index
    %9 = vector.load %arg4[%c0_6, %c0_7] : memref<128x8xbf16, #tpu.memory_space<vmem>>, vector<128x8xbf16>
    tpu.vector_store %arg4[%c0_6, %c0_7], %8 {strides = array<i32>} : memref<128x8xbf16, #tpu.memory_space<vmem>>, vector<128x8xbf16>,
    return
  }
  func.func @transform_0(%arg0: i32) -> (i32, i32) {
    %c0_i32 = arith.constant 0 : i32
    %c0_i32_0 = arith.constant 0 : i32
    return %arg0, %c0_i32 : i32, i32
  }
  func.func @transform_1(%arg0: i32) -> (i32, i32) {
    %c0_i32 = arith.constant 0 : i32
    %c0_i32_0 = arith.constant 0 : i32
    %c0_i32_1 = arith.constant 0 : i32
    return %c0_i32, %c0_i32_0 : i32, i32
  }
  func.func @transform_2(%arg0: i32) -> (i32, i32) {
    %c0_i32 = arith.constant 0 : i32
    %c0_i32_0 = arith.constant 0 : i32
    %c0_i32_1 = arith.constant 0 : i32
    return %c0_i32, %c0_i32_0 : i32, i32
  }
  func.func @transform_3(%arg0: i32) -> (i32, i32) {
    %c0_i32 = arith.constant 0 : i32
    %c0_i32_0 = arith.constant 0 : i32
    return %arg0, %c0_i32 : i32, i32
  }
}

</mosaic_0001>

<bundles_post_ra>
// kernel: tpu_custom_call.1
= control target key start
LH: loop header
LB: loop body
LE: loop exit
PB: predicated region body
PF: predicated region fallthrough
CT: control target
= control target key end

     0   :  { %vm118_vm0 = vcmask 1044480   ;;  %vm119_vm1 = vcmask 1045504   ;;  %vm93_vm2 = vcmask 220160   ;;  %v419_v1 = vmov 65535   ;;  %s545_s1 = inlined_call_operand.vmem [shape: bf16[27,8], index: 1, kind: input, shape index: {}]   ;;  %s546_s0 = inlined_call_operand.vmem [shape: bf16[128,27], index: 0, kind: input, shape index: {}]   ;;  %s547_s2 = inlined_call_operand.vmem [shape: f32[1,8], index: 2, kind: input, shape index: {}]   ;;  %s548_s3 = inlined_call_operand.vmem [shape: bf16[128,8], index: 3, kind: output, shape index: {}]  }
   0x1   :  { %v409_v0 = vld [vmem:[%s545_s1] sm:$0xff]   ;;  %v120_v2 = vsel %vm118_vm0, 4294967295, %v419_v1  ;;  %v410_v3 = vld [vmem:[%s545_s1 + $0x8] sm:$0x3f]   ;;  %v415_v10 = vld [vmem:[%s546_s0 + $0x10] sm:$0xff]   ;;  %vm302_vm3 = vcmask 60416  }
   0x2   :  { %384 = vmatprep.subr.bf16.mxu0 %v409_v0  ;;  %404 = vmatprep.subr.bf16.mxu1 %v409_v0  ;;  %v121_v4 = vsel %vm119_vm1, %v120_v2, 0  ;;  %v411_v5 = vld [vmem:[%s546_s0] sm:$0xff]   ;;  %v413_v8 = vld [vmem:[%s546_s0 + $0x8] sm:$0xff]   ;;  %v416_v11 = vld [vmem:[%s546_s0 + $0x30] sm:$0xff]  }
   0x3   :  { %385 = vmatpush3.bf16.msra.mxu0 %v409_v0  ;;  %406 = vmatpush3.bf16.msra.mxu1 %v409_v0  ;;  %v123_v6 = vand.u32 %v410_v3, %v121_v4  ;;  %v412_v7 = vld [vmem:[%s546_s0 + $0x20] sm:$0xff]   ;;  %v414_v9 = vld [vmem:[%s546_s0 + $0x28] sm:$0xff]   ;;  %v417_v12 = vld [vmem:[%s546_s0 + $0x18] sm:$0xff]  }
   0x4   :  { %388 = vmatprep.mubr.msk.bf16.mxu0 %vm93_vm2, %v411_v5  ;;  %396 = vmatprep.mubr.msk.bf16.mxu1 %vm93_vm2, %v412_v7  ;;  %v418_v13 = vld [vmem:[%s546_s0 + $0x38] sm:$0xff]   ;;  %v323_v14 = vld [vmem:[%s547_s2] ss:$0 sm:$0xff] }
   0x5   :  { %386 = vmatprep.subr.bf16.mxu0 %v123_v6  ;;  %405 = vmatprep.subr.bf16.mxu1 %v123_v6 }
   0x7   :  { %387 = vmatpush3.bf16.msra.mxu0 %v123_v6  ;;  %407 = vmatpush3.bf16.msra.mxu1 %v123_v6 }
   0xa   :  { %389 = vmatmul.mubr.msk.bf16.vlgmr.msra.gmra.mrb[0].mxu0 %vm93_vm2, %v413_v8  ;;  %397 = vmatmul.mubr.msk.bf16.vlgmr.msra.gmra.mrb[0].mxu1 %vm93_vm2, %v414_v9 }
   0xb   :  { %392 = vmatprep.mubr.msk.bf16.mxu0 %vm93_vm2, %v415_v10  ;;  %400 = vmatprep.mubr.msk.bf16.mxu1 %vm93_vm2, %v416_v11 }
  0x12   :  { %393 = vmatmul.mubr.msk.bf16.gmra.mrb[4].mxu0 %vm93_vm2, %v417_v12  ;;  %401 = vmatmul.mubr.msk.bf16.gmra.mrb[4].mxu1 %vm93_vm2, %v418_v13 }
  0xdd   :  { %v390_v15 = vpop.f32.mrb[0].mxu0  ;;  %v398_v16 = vpop.f32.mrb[0].mxu1 }
  0xde   :  { %v168_v17 = vadd.f32 %v390_v15, %v323_v14  ;;  %v200_v18 = vadd.f32 %v398_v16, %v323_v14  ;;  %v159_v19 = vpop.f32.mrb[1].mxu0  ;;  %v191_v20 = vpop.f32.mrb[1].mxu1 }
  0xdf   :  { %v160_v21 = vadd.f32 %v323_v14, %v159_v19  ;;  %v192_v22 = vadd.f32 %v323_v14, %v191_v20  ;;  %v391_v23 = vpop.f32.mrb[2].mxu0  ;;  %v399_v24 = vpop.f32.mrb[2].mxu1 }
  0xe0   :  { %v224_v25 = vmax.f32 %v168_v17, 0.0  ;;  %v232_v26 = vmax.f32 %v200_v18, 0.0  ;;  %v171_v27 = vadd.f32 %v391_v23, %v323_v14  ;;  %v203_v28 = vadd.f32 %v399_v24, %v323_v14  ;;  %v162_v29 = vpop.f32.mrb[3].mxu0  ;;  %v194_v30 = vpop.f32.mrb[3].mxu1 }
  0xe1   :  { %v222_v31 = vmax.f32 %v160_v21, 0.0  ;;  %v230_v32 = vmax.f32 %v192_v22, 0.0  ;;  %v163_v33 = vadd.f32 %v323_v14, %v162_v29  ;;  %v195_v34 = vadd.f32 %v323_v14, %v194_v30 }
  0xe2   :  { %v360_v35 = vpack.c.bf16 %v224_v25, %v224_v25  ;;  %v368_v36 = vpack.c.bf16 %v232_v26, %v232_v26  ;;  %v225_v37 = vmax.f32 %v171_v27, 0.0  ;;  %v233_v38 = vmax.f32 %v203_v28, 0.0 }
  0xe3   :  { %v358_v39 = vpack.c.bf16 %v222_v31, %v222_v31  ;;  %v366_v40 = vpack.c.bf16 %v230_v32, %v230_v32  ;;  %v223_v41 = vmax.f32 %v163_v33, 0.0  ;;  %v231_v42 = vmax.f32 %v195_v34, 0.0 }
  0xe4   :  { %305 = vst.msk [vmem:[%s548_s3 + $0x8] sm:$0xf] %vm302_vm3, %v360_v35  ;;  %313 = vst.msk [vmem:[%s548_s3 + $0x28] sm:$0xf] %vm302_vm3, %v368_v36  ;;  %v361_v43 = vpack.c.bf16 %v225_v37, %v225_v37  ;;  %v369_v44 = vpack.c.bf16 %v233_v38, %v233_v38 }
  0xe5   :  { %303 = vst.msk [vmem:[%s548_s3] sm:$0xf] %vm302_vm3, %v358_v39  ;;  %311 = vst.msk [vmem:[%s548_s3 + $0x20] sm:$0xf] %vm302_vm3, %v366_v40  ;;  %v359_v45 = vpack.c.bf16 %v223_v41, %v223_v41  ;;  %v367_v46 = vpack.c.bf16 %v231_v42, %v231_v42  ;;  %v394_v47 = vpop.f32.mrb[4].mxu0  ;;  %v402_v48 = vpop.f32.mrb[4].mxu1 }
  0xe6   :  { %306 = vst.msk [vmem:[%s548_s3 + $0xc] sm:$0xf] %vm302_vm3, %v361_v43  ;;  %314 = vst.msk [vmem:[%s548_s3 + $0x2c] sm:$0xf] %vm302_vm3, %v369_v44  ;;  %v184_v49 = vadd.f32 %v394_v47, %v323_v14  ;;  %v216_v50 = vadd.f32 %v402_v48, %v323_v14  ;;  %v175_v51 = vpop.f32.mrb[5].mxu0  ;;  %v207_v52 = vpop.f32.mrb[5].mxu1 }
  0xe7   :  { %304 = vst.msk [vmem:[%s548_s3 + $0x4] sm:$0xf] %vm302_vm3, %v359_v45  ;;  %312 = vst.msk [vmem:[%s548_s3 + $0x24] sm:$0xf] %vm302_vm3, %v367_v46  ;;  %v176_v53 = vadd.f32 %v323_v14, %v175_v51  ;;  %v208_v54 = vadd.f32 %v323_v14, %v207_v52  ;;  %v395_v55 = vpop.f32.mrb[6].mxu0  ;;  %v403_v56 = vpop.f32.mrb[6].mxu1 }
  0xe8   :  { %v228_v57 = vmax.f32 %v184_v49, 0.0  ;;  %v236_v58 = vmax.f32 %v216_v50, 0.0  ;;  %v187_v59 = vadd.f32 %v395_v55, %v323_v14  ;;  %v219_v60 = vadd.f32 %v403_v56, %v323_v14  ;;  %v178_v61 = vpop.f32.mrb[7].mxu0  ;;  %v210_v62 = vpop.f32.mrb[7].mxu1 }
  0xe9   :  { %v226_v63 = vmax.f32 %v176_v53, 0.0  ;;  %v234_v0 = vmax.f32 %v208_v54, 0.0  ;;  %v179_v1 = vadd.f32 %v323_v14, %v178_v61  ;;  %v211_v2 = vadd.f32 %v323_v14, %v210_v62 }
  0xea   :  { %v364_v3 = vpack.c.bf16 %v228_v57, %v228_v57  ;;  %v372_v4 = vpack.c.bf16 %v236_v58, %v236_v58  ;;  %v229_v5 = vmax.f32 %v187_v59, 0.0  ;;  %v237_v6 = vmax.f32 %v219_v60, 0.0 }
  0xeb   :  { %v362_v7 = vpack.c.bf16 %v226_v63, %v226_v63  ;;  %v370_v8 = vpack.c.bf16 %v234_v0, %v234_v0  ;;  %v227_v9 = vmax.f32 %v179_v1, 0.0  ;;  %v235_v10 = vmax.f32 %v211_v2, 0.0 }
  0xec   :  { %309 = vst.msk [vmem:[%s548_s3 + $0x18] sm:$0xf] %vm302_vm3, %v364_v3  ;;  %317 = vst.msk [vmem:[%s548_s3 + $0x38] sm:$0xf] %vm302_vm3, %v372_v4  ;;  %v365_v11 = vpack.c.bf16 %v229_v5, %v229_v5  ;;  %v373_v12 = vpack.c.bf16 %v237_v6, %v237_v6 }
  0xed   :  { %307 = vst.msk [vmem:[%s548_s3 + $0x10] sm:$0xf] %vm302_vm3, %v362_v7  ;;  %315 = vst.msk [vmem:[%s548_s3 + $0x30] sm:$0xf] %vm302_vm3, %v370_v8  ;;  %v363_v13 = vpack.c.bf16 %v227_v9, %v227_v9  ;;  %v371_v14 = vpack.c.bf16 %v235_v10, %v235_v10 }
  0xee   :  { %310 = vst.msk [vmem:[%s548_s3 + $0x1c] sm:$0xf] %vm302_vm3, %v365_v11  ;;  %318 = vst.msk [vmem:[%s548_s3 + $0x3c] sm:$0xf] %vm302_vm3, %v373_v12 }
  0xef   :  { %308 = vst.msk [vmem:[%s548_s3 + $0x14] sm:$0xf] %vm302_vm3, %v363_v13  ;;  %316 = vst.msk [vmem:[%s548_s3 + $0x34] sm:$0xf] %vm302_vm3, %v371_v14 }

</bundles_post_ra>
